<compile_context>
chip_gen: v7x
topology: tpu7x:2x2x1
jax: 0.10.0
libtpu: 0.0.40
codegen_flags: <defaults>
</compile_context>

<pallas_src>
import functools
import math

import jax
import jax.numpy as jnp
from jax.experimental import pallas as pl
from jax.experimental.pallas import tpu as pltpu


_VMEM_PIPELINE_BUDGET = 24 << 20   # target for double-buffered tiles (all gens)
_VMEM_LIMIT_BYTES = 32 << 20       # > v5e 16 MiB default, < v7x 64 MiB physical
_MAX_WBIG_BYTES = 1 << 20          # cap on kron-expanded resident weight


def _anchors_kernel(x_ref, w_ref, o_ref, *, compute_dtype):
    # x_ref: (TM_rows, K), w_ref: (N, K), o_ref: (TM_rows, N)
    x = x_ref[...]
    if x.dtype != compute_dtype:
        # In-kernel cast (VPU) overlaps with DMA; avoids a separate un-fused
        # whole-array cast pass through HBM in the wrapper.
        x = x.astype(compute_dtype)
    o_ref[...] = jax.lax.dot_general(
        x,
        w_ref[...],
        dimension_numbers=(((1,), (1,)), ((), ())),   # X @ W.T on the MXU
        preferred_element_type=jnp.float32,
    ).astype(o_ref.dtype)


def _round_up(x, m):
    return (x + m - 1) // m * m


def _round_down(x, m):
    return x // m * m


def anchors_forward(x, anchor_emb, *, compute_dtype=jnp.bfloat16, out_dtype=None):
    """input @ anchor_emb.T via a Pallas TPU kernel.

    x          : (..., dim_anchor)
    anchor_emb : (n_anchor, dim_anchor)
    returns    : (..., n_anchor)   (x.dtype unless out_dtype is given;
                                    bf16 MXU compute, f32 accumulation)
    """
    n_anchor, dim_anchor = anchor_emb.shape
    assert x.shape[-1] == dim_anchor
    lead_shape = x.shape[:-1]
    out_dtype = x.dtype if out_dtype is None else out_dtype

    x2d = x.reshape(-1, dim_anchor)
    m = x2d.shape[0]

    in_isz = jnp.dtype(x2d.dtype).itemsize
    out_isz = jnp.dtype(out_dtype).itemsize
    c_isz = jnp.dtype(compute_dtype).itemsize

    # ---- lane-dense slab grouping -----------------------------------------
    # Group g rows so the output slab width g*n_anchor is a multiple of the
    # 128-lane vreg width.  Row-major (m, n) and (m/g, g*n) are byte-identical,
    # so the wrapper reshapes are free.
    g = 128 // math.gcd(128, n_anchor)
    if g * g * n_anchor * dim_anchor * c_isz > _MAX_WBIG_BYTES:
        g = 1                      # expanded weight too large / flop inflation
    if g > 1 and m % g != 0:
        # Don't pay a whole-array jnp.pad just for the tail rows; fall back to
        # the plain layout (correct; only the stores become lane-sparse).
        g = 1

    m_slab = m // g
    k_slab = g * dim_anchor
    n_slab = g * n_anchor

    # Weight (tiny): block-diagonal kron(I_g, W), cast to compute dtype.
    w = anchor_emb.astype(jnp.float32)
    if g > 1:
        w = jnp.kron(jnp.eye(g, dtype=jnp.float32), w)
    w = w.astype(compute_dtype)

    # Byte-identical reshape to the lane-dense input slab (no data movement).
    x_slab = x2d.reshape(m_slab, k_slab) if g > 1 else x2d

    # ---- tile size: biggest that fits the VMEM pipeline budget ------------
    w_bytes = n_slab * k_slab * c_isz
    bytes_per_slab_row = 2 * (k_slab * in_isz + n_slab * out_isz)  # dbl-buffered
    tm_rows = _round_down(
        max(16, (_VMEM_PIPELINE_BUDGET - 2 * w_bytes) // bytes_per_slab_row), 16
    )
    tm_rows = max(16, min(tm_rows, _round_up(m_slab, 16)))

    n_steps = pl.cdiv(m_slab, tm_rows)
    # If one tile covers the whole (large) problem, split into 2 steps so the
    # "parallel" M axis can shard across both v7x TensorCores.
    if n_steps == 1 and m_slab >= 32 and tm_rows * k_slab * in_isz >= (2 << 20):
        tm_rows = _round_up(pl.cdiv(m_slab, 2), 16)
        n_steps = pl.cdiv(m_slab, tm_rows)

    grid = (n_steps,)

    kernel = functools.partial(_anchors_kernel, compute_dtype=compute_dtype)

    out_slab = pl.pallas_call(
        kernel,
        out_shape=jax.ShapeDtypeStruct((m_slab, n_slab), out_dtype),
        grid_spec=pltpu.PrefetchScalarGridSpec(
            num_scalar_prefetch=0,
            grid=grid,
            in_specs=[
                # X slab tile: marches down M (partial last block is masked).
                pl.BlockSpec((tm_rows, k_slab), lambda i: (i, 0)),
                # Expanded weight: same block every step -> stays resident.
                pl.BlockSpec((n_slab, k_slab), lambda i: (0, 0)),
            ],
            out_specs=pl.BlockSpec((tm_rows, n_slab), lambda i: (i, 0)),
        ),
        compiler_params=pltpu.CompilerParams(
            # Independent M blocks -> megacore sharding on v7x.
            dimension_semantics=("parallel",),
            vmem_limit_bytes=_VMEM_LIMIT_BYTES,
        ),
        cost_estimate=pl.CostEstimate(
            # Actual MXU work of the kron-expanded matmul (g x the logical flops).
            flops=2 * m_slab * n_slab * k_slab,
            transcendentals=0,
            bytes_accessed=(
                x_slab.size * in_isz          # input read at its native dtype
                + w.size * c_isz              # resident weight
                + m_slab * n_slab * out_isz   # output store
            ),
        ),
    )(x_slab, w)

    # Byte-identical reshape back; restore leading dims.
    out2d = out_slab.reshape(m, n_anchor) if g > 1 else out_slab
    return out2d.reshape(*lead_shape, n_anchor)


def init_anchor_emb(key, n_anchor, dim_anchor, dtype=jnp.float32):
    # Matches torch.nn.init.xavier_uniform_ for a 2-D parameter:
    # fan_out = size(0) = n_anchor, fan_in = size(1) = dim_anchor.
    bound = math.sqrt(6.0 / (n_anchor + dim_anchor))
    return jax.random.uniform(
        key, (n_anchor, dim_anchor), dtype=dtype, minval=-bound, maxval=bound
    )


if __name__ == "__main__":
    key = jax.random.PRNGKey(0)
    k_w, k_x = jax.random.split(key)

    n_anchor = 8
    dim_anchor = 32
    batch, seq = 2, 16  # input: (batch, seq, dim_anchor)

    anchor_emb = init_anchor_emb(k_w, n_anchor, dim_anchor)
    x = jax.random.normal(k_x, (batch, seq, dim_anchor), dtype=jnp.float32)

    out = anchors_forward(x, anchor_emb)
    out = jax.block_until_ready(out)

    assert out.shape == (batch, seq, n_anchor)
    assert out.dtype == x.dtype

    # Reference with the same bf16 rounding of the operands, f32 accumulation.
    x_bf = x.astype(jnp.bfloat16).astype(jnp.float32)
    w_bf = anchor_emb.astype(jnp.bfloat16).astype(jnp.float32)
    ref_bf = x_bf @ w_bf.T
    assert jnp.allclose(out, ref_bf, atol=1e-4, rtol=1e-4)

    # Loose sanity check against the exact f32 reference.
    ref_f32 = x @ anchor_emb.T
    assert jnp.allclose(out, ref_f32, atol=5e-2, rtol=5e-2)

    # Also exercise a ragged M (tail not divisible by the slab group) and a
    # pre-cast bf16 input to cover the fallback / no-cast paths.
    x_odd = jax.random.normal(k_x, (3, 7, dim_anchor), dtype=jnp.float32)
    out_odd = jax.block_until_ready(anchors_forward(x_odd, anchor_emb))
    ref_odd = (x_odd.astype(jnp.bfloat16).astype(jnp.float32)
               @ w_bf.T)
    assert out_odd.shape == (3, 7, n_anchor)
    assert jnp.allclose(out_odd, ref_odd, atol=1e-4, rtol=1e-4)

    print("KERNEL_OK")
</pallas_src>

<mosaic_0001>
module attributes {stable_mosaic.version = 11 : i64} {
  func.func @_anchors_kernel(%arg0: i32, %arg1: memref<16x512xf32, #tpu.memory_space<vmem>>, %arg2: memref<128x512xbf16, #tpu.memory_space<vmem>>, %arg3: memref<16x128xf32, #tpu.memory_space<vmem>>) attributes {dimension_semantics = [#tpu.dimension_semantics<parallel>], iteration_bounds = array<i64: 1>, scalar_prefetch = 0 : i64, scratch_operands = 0 : i64, tpu.core_type = #tpu.core_type<tc>, window_params = [{transform_indices = @transform_0, window_bounds = array<i64: 16, 512>}, {pipeline_mode = #tpu.pipeline_mode<synchronous>, transform_indices = @transform_1, window_bounds = array<i64: 128, 512>}, {transform_indices = @transform_2, window_bounds = array<i64: 16, 128>}]} {
    %c0 = arith.constant 0 : index
    %c0_0 = arith.constant 0 : index
    %0 = vector.load %arg1[%c0, %c0_0] : memref<16x512xf32, #tpu.memory_space<vmem>>, vector<16x512xf32>
    %1 = arith.truncf %0 : vector<16x512xf32> to vector<16x512xbf16>
    %c0_1 = arith.constant 0 : index
    %c0_2 = arith.constant 0 : index
    %2 = vector.load %arg2[%c0_1, %c0_2] : memref<128x512xbf16, #tpu.memory_space<vmem>>, vector<128x512xbf16>
    %cst = arith.constant dense<0.000000e+00> : vector<16x128xf32>
    %3 = tpu.matmul %1, %2, %cst {dimension_numbers = #tpu.dot_dimension_numbers<[1], [1], [0], [0], [0, 0, 1, 0], [], []>} : vector<16x512xbf16>, vector<128x512xbf16>, vector<16x128xf32> -> vector<16x128xf32>
    %c0_3 = arith.constant 0 : index
    %c0_4 = arith.constant 0 : index
    %4 = vector.load %arg3[%c0_3, %c0_4] : memref<16x128xf32, #tpu.memory_space<vmem>>, vector<16x128xf32>
    tpu.vector_store %arg3[%c0_3, %c0_4], %3 {strides = array<i32>} : memref<16x128xf32, #tpu.memory_space<vmem>>, vector<16x128xf32>,
    return
  }
  func.func @transform_0(%arg0: i32) -> (i32, i32) {
    %c0_i32 = arith.constant 0 : i32
    %c0_i32_0 = arith.constant 0 : i32
    return %arg0, %c0_i32 : i32, i32
  }
  func.func @transform_1(%arg0: i32) -> (i32, i32) {
    %c0_i32 = arith.constant 0 : i32
    %c0_i32_0 = arith.constant 0 : i32
    %c0_i32_1 = arith.constant 0 : i32
    return %c0_i32, %c0_i32_0 : i32, i32
  }
  func.func @transform_2(%arg0: i32) -> (i32, i32) {
    %c0_i32 = arith.constant 0 : i32
    %c0_i32_0 = arith.constant 0 : i32
    return %arg0, %c0_i32 : i32, i32
  }
}

</mosaic_0001>

<bundles_post_ra>
// kernel: tpu_custom_call.1
= control target key start
LH: loop header
LB: loop body
LE: loop exit
PB: predicated region body
PF: predicated region fallthrough
CT: control target
= control target key end

     0   :  { %7 = vsyncpa [#allocation3], 0  ;;  %s672_s0 = inlined_call_operand.hbm [shape: f32[2,512], index: 0, kind: input, shape index: {}]   ;;  %s673_s1 = inlined_call_operand.hbm [shape: bf16[128,512], index: 1, kind: input, shape index: {}]   ;;  %s674_s2 = inlined_call_operand.hbm [shape: f32[2,128], index: 2, kind: output, shape index: {}]  }
   0x1   :  { %8 = vsyncpa [#allocation6], 0 }
   0x2   :  { %9 = vsyncpa [#allocation4], 0 }
   0x3   :  { %14 = vsyncadd [#allocation3], 896  ;;  %s611_s9 = smov [#allocation2]   ;;  %s539_s13 = scalar_lea.hbm %s672_s0, 128 }
   0x4   :  { %s15_s10 = sshll.u32 %s611_s9, 4  ;;  %p540_p0 = scmp.ne.s32.totalorder %s672_s0, %s539_s13  ;;  %s16_s10 = int_to_ptr.vmem [resolvable:$true] %s15_s10 }
   0x5   :  { %p543_p1 = scmp.lt.u32.totalorder %s539_s13, %s672_s0 }
   0x7   :  { %p545_p2 = pnand %p543_p1, %p540_p0 }
   0x9   :  { %548 = shalt.err (!%p545_p2)
}
   0xa   :  { %s549_s18 = scalar_lea.vmem %s16_s10, 128  ;;  %s553_s19 = scalar_lea.vmem %s16_s10, 1024 }
   0xb   :  { %p550_p3 = scmp.ne.s32.totalorder %s16_s10, %s549_s18  ;;  %p554_p4 = scmp.lt.s32.totalorder %s16_s10, %s16_s10 }
   0xc   :  { %p555_p5 = scmp.lt.s32.totalorder %s553_s19, %s549_s18 }
   0xe   :  { %p556_p6 = por %p555_p5, %p554_p4 }
  0x10   :  { %p557_p7 = pnand %p556_p6, %p550_p3 }
  0x12   :  { %560 = shalt.err (!%p557_p7)
}
  0x13   :  { %s612_s20 = smov 128   ;;  %s613_s21 = smov 8  }
  0x14   :  { %21 = dma.hbm_to_vmem [thread:$0]  %s672_s0, 128, %s16_s10, [#allocation3], %s612_s20, %s612_s20, %s613_s21  }
  0x15   :  { %s614_s24 = smov [#allocation5]   ;;  %s561_s28 = scalar_lea.hbm %s673_s1, 4096 }
  0x16   :  { %s27_s25 = sshll.u32 %s614_s24, 4  ;;  %p562_p8 = scmp.ne.s32.totalorder %s673_s1, %s561_s28  ;;  %s28_s25 = int_to_ptr.vmem [resolvable:$true] %s27_s25 }
  0x17   :  { %p565_p9 = scmp.lt.u32.totalorder %s561_s28, %s673_s1 }
  0x19   :  { %p567_p10 = pnand %p565_p9, %p562_p8 }
  0x1b   :  { %570 = shalt.err (!%p567_p10)
}
  0x1c   :  { %s571_s5 = scalar_lea.vmem %s28_s25, 4096  ;;  %p576_p12 = scmp.lt.s32.totalorder %s28_s25, %s28_s25 }
  0x1d   :  { %p572_p11 = scmp.ne.s32.totalorder %s28_s25, %s571_s5  ;;  %p577_p13 = scmp.lt.s32.totalorder %s571_s5, %s571_s5 }
  0x1f   :  { %p578_p0 = por %p577_p13, %p576_p12 }
  0x21   :  { %p579_p1 = pnand %p578_p0, %p572_p11 }
  0x23   :  { %582 = shalt.err (!%p579_p1)
}
  0x24   :  { %s615_s0 = smov 256   ;;  %s616_s6 = smov 16  }
  0x25   :  { %33 = dma.hbm_to_vmem [thread:$0]  %s673_s1, 4096, %s28_s25, [#allocation6], %s615_s0, %s615_s0, %s616_s6  }
  0x26   :  { %605 = dma.done.wait [#allocation3], 1024  }
  0x27   :  { %606 = vsyncadd [#allocation3], 4294966272 }
  0x28   :  { %607 = dma.done.wait [#allocation6], 4096  }
  0x29   :  { %608 = vsyncadd [#allocation6], 4294963200  ;;  %v479_v0 = vld [vmem:[#allocation5 + $0x4] ss:$16 sps:$4 sm:$0xff]   ;;  %v481_v1 = vld [vmem:[#allocation5 + $0xc] ss:$16 sps:$4 sm:$0xff]   ;;  %v64_v12 = vlaneseq }
  0x2a   :  { %333 = vmatprep.subr.bf16.mxu1 %v479_v0  ;;  %v483_v2 = vld [vmem:[#allocation5] ss:$16 sps:$4 sm:$0xff]   ;;  %v484_v3 = vld [vmem:[#allocation5 + $0x8] ss:$16 sps:$4 sm:$0xff]   ;;  %374 = vmatprep.subr.bf16.mxu0 %v481_v1  ;;  %v485_v4 = vld [vmem:[#allocation5 + $0x24] ss:$16 sps:$4 sm:$0xff]  }
  0x2b   :  { %334 = vmatpush1.bf16.xpose.msra.mxu1 %v483_v2  ;;  %375 = vmatpush1.bf16.xpose.msra.mxu0 %v484_v3  ;;  %v487_v5 = vld [vmem:[#allocation5 + $0x2c] ss:$16 sps:$4 sm:$0xff]   ;;  %v489_v6 = vld [vmem:[#allocation5 + $0x20] ss:$16 sps:$4 sm:$0xff]   ;;  %v490_v7 = vld [vmem:[#allocation5 + $0x28] ss:$16 sps:$4 sm:$0xff]  }
  0x2c   :  { %335 = vmatprep.subr.bf16.mxu1 %v485_v4  ;;  %376 = vmatprep.subr.bf16.mxu0 %v487_v5  ;;  %v491_v8 = vld [vmem:[#allocation5 + $0x44] ss:$16 sps:$4 sm:$0xff]   ;;  %v493_v9 = vld [vmem:[#allocation5 + $0x4c] ss:$16 sps:$4 sm:$0xff]   ;;  %v617_v10 = vmov 1983009808  }
  0x2d   :  { %v62_v11 = vunpack.c.l.s4 %v617_v10  ;;  %v495_v13 = vld [vmem:[#allocation5 + $0x40] ss:$16 sps:$4 sm:$0xff]   ;;  %v496_v14 = vld [vmem:[#allocation5 + $0x48] ss:$16 sps:$4 sm:$0xff]   ;;  %v497_v15 = vld [vmem:[#allocation5 + $0x64] ss:$16 sps:$4 sm:$0xff]  }
  0x2e   :  { %v499_v16 = vld [vmem:[#allocation5 + $0x6c] ss:$16 sps:$4 sm:$0xff]   ;;  %v65_v18 = vshrl.u32 %v64_v12, 7  ;;  %v501_v19 = vld [vmem:[#allocation5 + $0x60] ss:$16 sps:$4 sm:$0xff]  }
  0x2f   :  { %v63_v17 = vunpack.c.0.s8 %v62_v11  ;;  %v502_v20 = vld [vmem:[#allocation5 + $0x68] ss:$16 sps:$4 sm:$0xff]   ;;  %v503_v22 = vld [vmem:[#allocation5 + $0x84] ss:$16 sps:$4 sm:$0xff]   ;;  %v505_v23 = vld [vmem:[#allocation5 + $0x8c] ss:$16 sps:$4 sm:$0xff]  }
  0x30   :  { %v527_v24 = vld [vmem:[#allocation2] ss:$8 sps:$4 sm:$0xff]   ;;  %v529_v25 = vld [vmem:[#allocation2 + $0x10] ss:$8 sps:$4 sm:$0xff]   ;;  %v535_v28 = vld [vmem:[#allocation2 + $0x4] ss:$8 sps:$4 sm:$0xff]  }
  0x31   :  { %v66_v21 = vsub.s32 %v63_v17, %v65_v18  ;;  %v531_v26 = vld [vmem:[#allocation2 + $0x20] ss:$8 sps:$4 sm:$0xff]   ;;  %v533_v27 = vld [vmem:[#allocation2 + $0x30] ss:$8 sps:$4 sm:$0xff]   ;;  %v536_v29 = vld [vmem:[#allocation2 + $0x14] ss:$8 sps:$4 sm:$0xff]  }
  0x32   :  { %v537_v33 = vld [vmem:[#allocation2 + $0x24] ss:$8 sps:$4 sm:$0xff]   ;;  %v538_v34 = vld [vmem:[#allocation2 + $0x34] ss:$8 sps:$4 sm:$0xff]   ;;  %v507_v45 = vld [vmem:[#allocation5 + $0x80] ss:$16 sps:$4 sm:$0xff]  }
  0x33   :  { %336 = vmatpush1.bf16.xpose.msra.mxu1 %v489_v6  ;;  %377 = vmatpush1.bf16.xpose.msra.mxu0 %v490_v7  ;;  %v67_v30 = vrot.slane %v527_v24, %v66_v21  ;;  %v81_v31 = vrot.slane %v529_v25, %v66_v21  ;;  %v103_v32 = vrot.slane %v531_v26, %v66_v21  ;;  %v508_v46 = vld [vmem:[#allocation5 + $0x88] ss:$16 sps:$4 sm:$0xff]   ;;  %v509_v48 = vld [vmem:[#allocation5 + $0xa4] ss:$16 sps:$4 sm:$0xff]   ;;  %v511_v49 = vld [vmem:[#allocation5 + $0xac] ss:$16 sps:$4 sm:$0xff]  }
  0x34   :  { %337 = vmatprep.subr.bf16.mxu1 %v491_v8  ;;  %378 = vmatprep.subr.bf16.mxu0 %v493_v9  ;;  %v117_v35 = vrot.slane %v533_v27, %v66_v21  ;;  %v74_v36 = vrot.slane %v535_v28, %v66_v21  ;;  %v88_v37 = vrot.slane %v536_v29, %v66_v21  ;;  %v513_v50 = vld [vmem:[#allocation5 + $0xa0] ss:$16 sps:$4 sm:$0xff]   ;;  %v514_v51 = vld [vmem:[#allocation5 + $0xa8] ss:$16 sps:$4 sm:$0xff]   ;;  %v515_v52 = vld [vmem:[#allocation5 + $0xc4] ss:$16 sps:$4 sm:$0xff]  }
  0x35   :  { %v90_v38 = vcombine.high %v67_v30, %v81_v31  ;;  %v110_v39 = vrot.slane %v537_v33, %v66_v21  ;;  %v124_v40 = vrot.slane %v538_v34, %v66_v21  ;;  %v517_v53 = vld [vmem:[#allocation5 + $0xcc] ss:$16 sps:$4 sm:$0xff]   ;;  %v519_v54 = vld [vmem:[#allocation5 + $0xc0] ss:$16 sps:$4 sm:$0xff]   ;;  %v520_v55 = vld [vmem:[#allocation5 + $0xc8] ss:$16 sps:$4 sm:$0xff]   ;;  %v89_v60 = vcombine.low %v67_v30, %v81_v31 }
  0x36   :  { %v126_v41 = vcombine.high %v103_v32, %v117_v35  ;;  %v92_v42 = vcombine.high %v74_v36, %v88_v37  ;;  %v521_v56 = vld [vmem:[#allocation5 + $0xe4] ss:$16 sps:$4 sm:$0xff]   ;;  %v523_v57 = vld [vmem:[#allocation5 + $0xec] ss:$16 sps:$4 sm:$0xff]   ;;  %v525_v58 = vld [vmem:[#allocation5 + $0xe0] ss:$16 sps:$4 sm:$0xff]   ;;  %v125_v61 = vcombine.low %v103_v32, %v117_v35  ;;  %v91_v62 = vcombine.low %v74_v36, %v88_v37 }
  0x37   :  { %v128_v43 = vcombine.high %v110_v39, %v124_v40  ;;  %v526_v59 = vld [vmem:[#allocation5 + $0xe8] ss:$16 sps:$4 sm:$0xff]   ;;  %v127_v63 = vcombine.low %v110_v39, %v124_v40 }
  0x38   :  { %v138_v44 = vpack.c.bf16 %v126_v41, %v90_v38  ;;  %v137_v0 = vpack.c.bf16 %v125_v61, %v89_v60 }
  0x39   :  { %v140_v47 = vpack.c.bf16 %v128_v43, %v92_v42  ;;  %v139_v1 = vpack.c.bf16 %v127_v63, %v91_v62 }
  0x3a   :  { %365 = vmatprep.mubr.bf16.mxu1 %v138_v44 }
  0x3b   :  { %338 = vmatpush1.bf16.xpose.msra.mxu1 %v495_v13  ;;  %379 = vmatpush1.bf16.xpose.msra.mxu0 %v496_v14 }
  0x3c   :  { %339 = vmatprep.subr.bf16.mxu1 %v497_v15  ;;  %380 = vmatprep.subr.bf16.mxu0 %v499_v16 }
  0x3d   :  { %406 = vmatprep.mubr.bf16.mxu0 %v140_v47 }
  0x43   :  { %340 = vmatpush1.bf16.xpose.msra.mxu1 %v501_v19  ;;  %381 = vmatpush1.bf16.xpose.msra.mxu0 %v502_v20 }
  0x44   :  { %341 = vmatprep.subr.bf16.mxu1 %v503_v22  ;;  %382 = vmatprep.subr.bf16.mxu0 %v505_v23 }
  0x4b   :  { %342 = vmatpush1.bf16.xpose.msra.mxu1 %v507_v45  ;;  %383 = vmatpush1.bf16.xpose.msra.mxu0 %v508_v46 }
  0x4c   :  { %343 = vmatprep.subr.bf16.mxu1 %v509_v48  ;;  %384 = vmatprep.subr.bf16.mxu0 %v511_v49 }
  0x53   :  { %344 = vmatpush1.bf16.xpose.msra.mxu1 %v513_v50  ;;  %385 = vmatpush1.bf16.xpose.msra.mxu0 %v514_v51 }
  0x54   :  { %345 = vmatprep.subr.bf16.mxu1 %v515_v52  ;;  %386 = vmatprep.subr.bf16.mxu0 %v517_v53 }
  0x5b   :  { %346 = vmatpush1.bf16.xpose.msra.mxu1 %v519_v54  ;;  %387 = vmatpush1.bf16.xpose.msra.mxu0 %v520_v55 }
  0x5c   :  { %347 = vmatprep.subr.bf16.mxu1 %v521_v56  ;;  %388 = vmatprep.subr.bf16.mxu0 %v523_v57 }
  0x63   :  { %348 = vmatpush1.bf16.xpose.msra.mxu1 %v525_v58  ;;  %389 = vmatpush1.bf16.xpose.msra.mxu0 %v526_v59 }
  0x6a   :  { %366 = vmatmul.mubr.bf16.vlgmr.msra.gmra.mrb[0].mxu1 %v137_v0  ;;  %407 = vmatmul.mubr.bf16.vlgmr.msra.gmra.mrb[0].mxu0 %v139_v1 }
 0x13d   :  { %v367_v2 = vpop.f32.mrb[0].mxu1  ;;  %v408_v3 = vpop.f32.mrb[0].mxu0 }
 0x13e   :  { %v409_v4 = vadd.f32 %v408_v3, %v367_v2  ;;  %v369_v5 = vpop.f32.mrb[1].mxu1  ;;  %v410_v6 = vpop.f32.mrb[1].mxu0 }
 0x13f   :  { %v370_v7 = vpop.f32.mrb[2].mxu1  ;;  %v411_v8 = vpop.f32.mrb[2].mxu0 }
 0x140   :  { %415 = vst [vmem:[#allocation7] sm:$0xff] %v409_v4  ;;  %v412_v9 = vadd.f32 %v411_v8, %v370_v7  ;;  %v372_v10 = vpop.f32.mrb[3].mxu1  ;;  %v413_v11 = vpop.f32.mrb[3].mxu0 }
 0x142   :  { %416 = vst [vmem:[#allocation7 + $0x8] sm:$0xff] %v412_v9 }
 0x143   :  { %421 = vsyncadd [#allocation4], 224  ;;  %s618_s1 = smov [#allocation7]  }
 0x144   :  { %s422_s9 = sshll.u32 %s618_s1, 4  ;;  %s423_s9 = int_to_ptr.vmem [resolvable:$true] %s422_s9 }
 0x145   :  { %s583_s10 = scalar_lea.vmem %s423_s9, 32  ;;  %s587_s11 = scalar_lea.vmem %s423_s9, 256 }
 0x146   :  { %p584_p2 = scmp.ne.s32.totalorder %s423_s9, %s583_s10  ;;  %p588_p3 = scmp.lt.s32.totalorder %s423_s9, %s423_s9 }
 0x147   :  { %p589_p4 = scmp.lt.s32.totalorder %s587_s11, %s583_s10 }
 0x149   :  { %p590_p5 = por %p589_p4, %p588_p3 }
 0x14b   :  { %p591_p6 = pnand %p590_p5, %p584_p2 }
 0x14d   :  { %594 = shalt.err (!%p591_p6)
}
 0x14e   :  { %s595_s14 = scalar_lea.hbm %s674_s2, 32 }
 0x14f   :  { %p596_p7 = scmp.ne.s32.totalorder %s674_s2, %s595_s14  ;;  %p599_p8 = scmp.lt.u32.totalorder %s595_s14, %s674_s2 }
 0x151   :  { %p601_p9 = pnand %p599_p8, %p596_p7 }
 0x153   :  { %604 = shalt.err (!%p601_p9)
}
 0x154   :  { %s619_s19 = smov 32   ;;  %s620_s20 = smov 2  }
 0x155   :  { %428 = dma.vmem_to_hbm [thread:$0]  %s423_s9, 32, %s674_s2, [#allocation4], %s619_s19, %s619_s19, %s620_s20  }
 0x156   :  { %609 = dma.done.wait [#allocation4], 256  }
 0x157   :  { %610 = vsyncadd [#allocation4], 4294967040 }
 0x158   :  { %432 = vsyncpa [#allocation3], 1 }
 0x159   :  { %433 = vsyncpa [#allocation6], 1 }
 0x15a   :  { %434 = vsyncpa [#allocation4], 1 }

</bundles_post_ra>
